<compile_context>
chip_gen: v5e
topology: v5e:2x2
jax: 0.10.0
libtpu: 0.0.40
codegen_flags: <defaults>
</compile_context>

<pallas_src>
import jax
import jax.numpy as jnp
from jax.experimental import pallas as pl
from jax.experimental.pallas import tpu as pltpu


def _leaky_relu(x, slope=0.01):
    # torch.nn.LeakyReLU default negative_slope = 0.01
    return jnp.where(x > 0, x, slope * x)


def _round_up(x, m):
    return (x + m - 1) // m * m


def reward_kernel(s_ref, a_ref, w1s_ref, w1a_ref, b1_ref, w2_ref, b2_ref,
                  w3_ref, b3_ref, o_ref):
    # Hoisted bias / final-weight loads (single VPU-fused pass per tile).
    b1 = b1_ref[...]                       # [1, H]  f32
    b2 = b2_ref[...]                       # [1, H]  f32
    b3 = b3_ref[...]                       # [1, 1]  f32
    w3 = w3_ref[...].astype(jnp.float32)   # [1, H]

    # Layer 1: split matmul (no concat needed) — MXU, f32 accumulation.
    h1 = jnp.dot(s_ref[...], w1s_ref[...], preferred_element_type=jnp.float32)
    h1 = h1 + jnp.dot(a_ref[...], w1a_ref[...], preferred_element_type=jnp.float32)
    h1 = _leaky_relu(h1 + b1)                                  # [TB, H] f32

    # Layer 2 — cast operand to the MXU dtype (no-op for f32 path).
    h2 = jnp.dot(h1.astype(w2_ref.dtype), w2_ref[...],
                 preferred_element_type=jnp.float32)
    h2 = _leaky_relu(h2 + b2)                                  # [TB, H] f32

    # Layer 3: N=1 matmul would waste the MXU -> VPU multiply + lane reduce.
    r = jnp.sum(h2 * w3, axis=-1, keepdims=True) + b3          # [TB, 1]
    o_ref[...] = r.astype(o_ref.dtype)


def reward_net_forward(state, action, params, *, block_b=512,
                       mxu_dtype=jnp.float32):
    """state: [B, obs_dim], action: [B, act_dim] -> reward [B, 1] (f32)."""
    w1s, w1a, b1, w2, b2, w3, b3 = params
    B, obs_dim = state.shape
    act_dim = action.shape[1]
    hidden = w2.shape[0]

    # Batch tile: multiple of 8, capped by block_b; pad B up to a multiple of it.
    tb = _round_up(min(block_b, _round_up(B, 8)), 8)
    B_pad = _round_up(B, tb)
    grid = B_pad // tb

    state = state.astype(mxu_dtype)
    action = action.astype(mxu_dtype)
    if B_pad != B:
        pad = B_pad - B
        state = jnp.pad(state, ((0, pad), (0, 0)))
        action = jnp.pad(action, ((0, pad), (0, 0)))

    # Matmul operands in mxu_dtype; biases stay f32 (accumulation dtype).
    w1s = w1s.astype(mxu_dtype)
    w1a = w1a.astype(mxu_dtype)
    w2 = w2.astype(mxu_dtype)
    w3 = w3.astype(mxu_dtype)
    b1 = b1.astype(jnp.float32)
    b2 = b2.astype(jnp.float32)
    b3 = b3.astype(jnp.float32)

    const = lambda i: (0, 0)   # weights/biases: same block every step -> resident
    grid_spec = pltpu.PrefetchScalarGridSpec(
        num_scalar_prefetch=0,
        grid=(grid,),
        in_specs=[
            pl.BlockSpec((tb, obs_dim), lambda i: (i, 0)),     # state tile
            pl.BlockSpec((tb, act_dim), lambda i: (i, 0)),     # action tile
            pl.BlockSpec((obs_dim, hidden), const),            # w1_s
            pl.BlockSpec((act_dim, hidden), const),            # w1_a
            pl.BlockSpec((1, hidden), const),                  # b1
            pl.BlockSpec((hidden, hidden), const),             # w2
            pl.BlockSpec((1, hidden), const),                  # b2
            pl.BlockSpec((1, hidden), const),                  # w3 (row)
            pl.BlockSpec((1, 1), const),                       # b3
        ],
        out_specs=pl.BlockSpec((tb, 1), lambda i: (i, 0)),
    )

    out = pl.pallas_call(
        reward_kernel,
        out_shape=jax.ShapeDtypeStruct((B_pad, 1), jnp.float32),
        grid_spec=grid_spec,
        compiler_params=pltpu.CompilerParams(
            dimension_semantics=("parallel",),      # shard batch grid across TCs (v7x)
            vmem_limit_bytes=32 * 1024 * 1024,      # safe on v5e/v6e/v7x
        ),
    )(state, action, w1s, w1a, b1, w2, b2, w3, b3)
    return out[:B]


def _orthogonal(key, rows, cols):
    """Semi-orthogonal matrix of shape [rows, cols] (mirrors nn.init.orthogonal_)."""
    n = max(rows, cols)
    a = jax.random.normal(key, (n, n), dtype=jnp.float32)
    q, r = jnp.linalg.qr(a)
    d = jnp.diag(r)
    q = q * jnp.where(d >= 0, 1.0, -1.0)[None, :]   # robust sign correction
    return q[:rows, :cols]


def init_params(key, obs_dim, act_dim, hidden_dim):
    """weight_init: Linear weights orthogonal, biases zero.

    Stored layout: w1 split into [obs_dim,H] / [act_dim,H] (kernel does s@w1_s + a@w1_a,
    equivalent to cat[s,a] @ w1); w2 as [H,H] (x @ W); w3 as torch row [1,H]."""
    k1, k2, k3 = jax.random.split(key, 3)
    in_dim = obs_dim + act_dim
    w1_t = _orthogonal(k1, hidden_dim, in_dim).T        # [in, H]
    w1s, w1a = w1_t[:obs_dim], w1_t[obs_dim:]
    w2 = _orthogonal(k2, hidden_dim, hidden_dim).T      # [H, H]
    w3 = _orthogonal(k3, 1, hidden_dim)                 # [1, H]
    b1 = jnp.zeros((1, hidden_dim), jnp.float32)
    b2 = jnp.zeros((1, hidden_dim), jnp.float32)
    b3 = jnp.zeros((1, 1), jnp.float32)
    return (w1s, w1a, b1, w2, b2, w3, b3)


def reference_forward(state, action, params):
    """Pure-JAX f32 reference for correctness check."""
    w1s, w1a, b1, w2, b2, w3, b3 = params
    h1 = _leaky_relu(state @ w1s + action @ w1a + b1)
    h2 = _leaky_relu(h1 @ w2 + b2)
    return h2 @ w3.T + b3


if __name__ == "__main__":
    key = jax.random.PRNGKey(0)
    k_state, k_action, k_params = jax.random.split(key, 3)

    # Small shapes; B not a multiple of the tile to exercise padding + multi-step grid.
    B, obs_dim, act_dim, hidden_dim = 300, 16, 4, 32
    state = jax.random.normal(k_state, (B, obs_dim), dtype=jnp.float32)
    action = jax.random.normal(k_action, (B, act_dim), dtype=jnp.float32)
    params = init_params(k_params, obs_dim, act_dim, hidden_dim)

    ref = reference_forward(state, action, params)

    # f32 MXU path: matches the pure-JAX reference tightly.
    out = jax.block_until_ready(
        reward_net_forward(state, action, params, block_b=128))
    assert out.shape == (B, 1)
    assert jnp.allclose(out, ref, atol=1e-4, rtol=1e-4), (out[:4], ref[:4])

    # bf16 MXU-operand path (v5e/v6e DMA/MXU optimization): looser tolerance.
    out_bf16 = jax.block_until_ready(
        reward_net_forward(state, action, params, block_b=128,
                           mxu_dtype=jnp.bfloat16))
    assert out_bf16.shape == (B, 1)
    assert float(jnp.max(jnp.abs(out_bf16 - ref))) < 0.25

    print("KERNEL_OK")
</pallas_src>

<mosaic_0001>
module attributes {stable_mosaic.version = 11 : i64} {
  func.func @reward_kernel(%arg0: i32, %arg1: memref<128x16xf32, #tpu.memory_space<vmem>>, %arg2: memref<128x4xf32, #tpu.memory_space<vmem>>, %arg3: memref<16x32xf32, #tpu.memory_space<vmem>>, %arg4: memref<4x32xf32, #tpu.memory_space<vmem>>, %arg5: memref<1x32xf32, #tpu.memory_space<vmem>>, %arg6: memref<32x32xf32, #tpu.memory_space<vmem>>, %arg7: memref<1x32xf32, #tpu.memory_space<vmem>>, %arg8: memref<1x32xf32, #tpu.memory_space<vmem>>, %arg9: memref<1x1xf32, #tpu.memory_space<vmem>>, %arg10: memref<128x1xf32, #tpu.memory_space<vmem>>) attributes {dimension_semantics = [#tpu.dimension_semantics<parallel>], iteration_bounds = array<i64: 3>, scalar_prefetch = 0 : i64, scratch_operands = 0 : i64, tpu.core_type = #tpu.core_type<tc>, window_params = [{transform_indices = @transform_0, window_bounds = array<i64: 128, 16>}, {transform_indices = @transform_1, window_bounds = array<i64: 128, 4>}, {pipeline_mode = #tpu.pipeline_mode<synchronous>, transform_indices = @transform_2, window_bounds = array<i64: 16, 32>}, {pipeline_mode = #tpu.pipeline_mode<synchronous>, transform_indices = @transform_3, window_bounds = array<i64: 4, 32>}, {pipeline_mode = #tpu.pipeline_mode<synchronous>, transform_indices = @transform_4, window_bounds = array<i64: 1, 32>}, {pipeline_mode = #tpu.pipeline_mode<synchronous>, transform_indices = @transform_5, window_bounds = array<i64: 32, 32>}, {pipeline_mode = #tpu.pipeline_mode<synchronous>, transform_indices = @transform_6, window_bounds = array<i64: 1, 32>}, {pipeline_mode = #tpu.pipeline_mode<synchronous>, transform_indices = @transform_7, window_bounds = array<i64: 1, 32>}, {pipeline_mode = #tpu.pipeline_mode<synchronous>, transform_indices = @transform_8, window_bounds = array<i64: 1, 1>}, {transform_indices = @transform_9, window_bounds = array<i64: 128, 1>}]} {
    %c0 = arith.constant 0 : index
    %c0_0 = arith.constant 0 : index
    %0 = vector.load %arg5[%c0, %c0_0] : memref<1x32xf32, #tpu.memory_space<vmem>>, vector<1x32xf32>
    %c0_1 = arith.constant 0 : index
    %c0_2 = arith.constant 0 : index
    %1 = vector.load %arg7[%c0_1, %c0_2] : memref<1x32xf32, #tpu.memory_space<vmem>>, vector<1x32xf32>
    %c0_3 = arith.constant 0 : index
    %c0_4 = arith.constant 0 : index
    %2 = vector.load %arg9[%c0_3, %c0_4] : memref<1x1xf32, #tpu.memory_space<vmem>>, vector<1x1xf32>
    %c0_5 = arith.constant 0 : index
    %c0_6 = arith.constant 0 : index
    %3 = vector.load %arg8[%c0_5, %c0_6] : memref<1x32xf32, #tpu.memory_space<vmem>>, vector<1x32xf32>
    %c0_7 = arith.constant 0 : index
    %c0_8 = arith.constant 0 : index
    %4 = vector.load %arg1[%c0_7, %c0_8] : memref<128x16xf32, #tpu.memory_space<vmem>>, vector<128x16xf32>
    %c0_9 = arith.constant 0 : index
    %c0_10 = arith.constant 0 : index
    %5 = vector.load %arg3[%c0_9, %c0_10] : memref<16x32xf32, #tpu.memory_space<vmem>>, vector<16x32xf32>
    %cst = arith.constant dense<0.000000e+00> : vector<128x32xf32>
    %6 = tpu.matmul %4, %5, %cst {dimension_numbers = #tpu.dot_dimension_numbers<[1], [0], [0], [1], [0, 0, 1, 1], [], []>} : vector<128x16xf32>, vector<16x32xf32>, vector<128x32xf32> -> vector<128x32xf32>
    %c0_11 = arith.constant 0 : index
    %c0_12 = arith.constant 0 : index
    %7 = vector.load %arg2[%c0_11, %c0_12] : memref<128x4xf32, #tpu.memory_space<vmem>>, vector<128x4xf32>
    %c0_13 = arith.constant 0 : index
    %c0_14 = arith.constant 0 : index
    %8 = vector.load %arg4[%c0_13, %c0_14] : memref<4x32xf32, #tpu.memory_space<vmem>>, vector<4x32xf32>
    %cst_15 = arith.constant dense<0.000000e+00> : vector<128x32xf32>
    %9 = tpu.matmul %7, %8, %cst_15 {dimension_numbers = #tpu.dot_dimension_numbers<[1], [0], [0], [1], [0, 0, 1, 1], [], []>} : vector<128x4xf32>, vector<4x32xf32>, vector<128x32xf32> -> vector<128x32xf32>
    %10 = arith.addf %6, %9 : vector<128x32xf32>
    %11 = vector.broadcast %0 : vector<1x32xf32> to vector<128x32xf32>
    %12 = arith.addf %10, %11 : vector<128x32xf32>
    %cst_16 = arith.constant 0.000000e+00 : f32
    %13 = vector.broadcast %cst_16 : f32 to vector<128x32xf32>
    %14 = arith.cmpf ogt, %12, %13 : vector<128x32xf32>
    %cst_17 = arith.constant 0.00999999977 : f32
    %15 = vector.broadcast %cst_17 : f32 to vector<128x32xf32>
    %16 = arith.mulf %15, %12 : vector<128x32xf32>
    %17 = arith.select %14, %12, %16 : vector<128x32xi1>, vector<128x32xf32>
    %c0_18 = arith.constant 0 : index
    %c0_19 = arith.constant 0 : index
    %18 = vector.load %arg6[%c0_18, %c0_19] : memref<32x32xf32, #tpu.memory_space<vmem>>, vector<32x32xf32>
    %cst_20 = arith.constant dense<0.000000e+00> : vector<128x32xf32>
    %19 = tpu.matmul %17, %18, %cst_20 {dimension_numbers = #tpu.dot_dimension_numbers<[1], [0], [0], [1], [0, 0, 1, 1], [], []>} : vector<128x32xf32>, vector<32x32xf32>, vector<128x32xf32> -> vector<128x32xf32>
    %20 = vector.broadcast %1 : vector<1x32xf32> to vector<128x32xf32>
    %21 = arith.addf %19, %20 : vector<128x32xf32>
    %cst_21 = arith.constant 0.000000e+00 : f32
    %22 = vector.broadcast %cst_21 : f32 to vector<128x32xf32>
    %23 = arith.cmpf ogt, %21, %22 : vector<128x32xf32>
    %cst_22 = arith.constant 0.00999999977 : f32
    %24 = vector.broadcast %cst_22 : f32 to vector<128x32xf32>
    %25 = arith.mulf %24, %21 : vector<128x32xf32>
    %26 = arith.select %23, %21, %25 : vector<128x32xi1>, vector<128x32xf32>
    %27 = vector.broadcast %3 : vector<1x32xf32> to vector<128x32xf32>
    %28 = arith.mulf %26, %27 : vector<128x32xf32>
    %cst_23 = arith.constant dense<0.000000e+00> : vector<128xf32>
    %29 = vector.multi_reduction <add>, %28, %cst_23 [1] : vector<128x32xf32> to vector<128xf32>
    %30 = vector.shape_cast %29 : vector<128xf32> to vector<128x1xf32>
    %31 = vector.broadcast %2 : vector<1x1xf32> to vector<128x1xf32>
    %32 = arith.addf %30, %31 : vector<128x1xf32>
    %c0_24 = arith.constant 0 : index
    %c0_25 = arith.constant 0 : index
    %33 = vector.load %arg10[%c0_24, %c0_25] : memref<128x1xf32, #tpu.memory_space<vmem>>, vector<128x1xf32>
    tpu.vector_store %arg10[%c0_24, %c0_25], %32 {strides = array<i32>} : memref<128x1xf32, #tpu.memory_space<vmem>>, vector<128x1xf32>,
    return
  }
  func.func @transform_0(%arg0: i32) -> (i32, i32) {
    %c0_i32 = arith.constant 0 : i32
    %c0_i32_0 = arith.constant 0 : i32
    return %arg0, %c0_i32 : i32, i32
  }
  func.func @transform_1(%arg0: i32) -> (i32, i32) {
    %c0_i32 = arith.constant 0 : i32
    %c0_i32_0 = arith.constant 0 : i32
    return %arg0, %c0_i32 : i32, i32
  }
  func.func @transform_2(%arg0: i32) -> (i32, i32) {
    %c0_i32 = arith.constant 0 : i32
    %c0_i32_0 = arith.constant 0 : i32
    %c0_i32_1 = arith.constant 0 : i32
    return %c0_i32, %c0_i32_0 : i32, i32
  }
  func.func @transform_3(%arg0: i32) -> (i32, i32) {
    %c0_i32 = arith.constant 0 : i32
    %c0_i32_0 = arith.constant 0 : i32
    %c0_i32_1 = arith.constant 0 : i32
    return %c0_i32, %c0_i32_0 : i32, i32
  }
  func.func @transform_4(%arg0: i32) -> (i32, i32) {
    %c0_i32 = arith.constant 0 : i32
    %c0_i32_0 = arith.constant 0 : i32
    %c0_i32_1 = arith.constant 0 : i32
    return %c0_i32, %c0_i32_0 : i32, i32
  }
  func.func @transform_5(%arg0: i32) -> (i32, i32) {
    %c0_i32 = arith.constant 0 : i32
    %c0_i32_0 = arith.constant 0 : i32
    %c0_i32_1 = arith.constant 0 : i32
    return %c0_i32, %c0_i32_0 : i32, i32
  }
  func.func @transform_6(%arg0: i32) -> (i32, i32) {
    %c0_i32 = arith.constant 0 : i32
    %c0_i32_0 = arith.constant 0 : i32
    %c0_i32_1 = arith.constant 0 : i32
    return %c0_i32, %c0_i32_0 : i32, i32
  }
  func.func @transform_7(%arg0: i32) -> (i32, i32) {
    %c0_i32 = arith.constant 0 : i32
    %c0_i32_0 = arith.constant 0 : i32
    %c0_i32_1 = arith.constant 0 : i32
    return %c0_i32, %c0_i32_0 : i32, i32
  }
  func.func @transform_8(%arg0: i32) -> (i32, i32) {
    %c0_i32 = arith.constant 0 : i32
    %c0_i32_0 = arith.constant 0 : i32
    %c0_i32_1 = arith.constant 0 : i32
    return %c0_i32, %c0_i32_0 : i32, i32
  }
  func.func @transform_9(%arg0: i32) -> (i32, i32) {
    %c0_i32 = arith.constant 0 : i32
    %c0_i32_0 = arith.constant 0 : i32
    return %arg0, %c0_i32 : i32, i32
  }
}

</mosaic_0001>

<bundles_post_ra>
// kernel: tpu_custom_call.1
= control target key start
LH: loop header
LB: loop body
LE: loop exit
PB: predicated region body
PF: predicated region fallthrough
CT: control target
= control target key end

     0   :  { %s1180_s11 = smov 0   ;;  %s1423_s0 = inlined_call_operand.vmem [shape: f32[384,16], index: 0, kind: input, shape index: {}]   ;;  %s1424_s1 = inlined_call_operand.vmem [shape: f32[384,4], index: 1, kind: input, shape index: {}]   ;;  %s1425_s2 = inlined_call_operand.vmem [shape: f32[16,32], index: 2, kind: input, shape index: {}]   ;;  %s1426_s3 = inlined_call_operand.vmem [shape: f32[4,32], index: 3, kind: input, shape index: {}]   ;;  %s1427_s4 = inlined_call_operand.vmem [shape: f32[1,32], index: 4, kind: input, shape index: {}]   ;;  %s1428_s5 = inlined_call_operand.vmem [shape: f32[32,32], index: 5, kind: input, shape index: {}]   ;;  %s1429_s6 = inlined_call_operand.vmem [shape: f32[1,32], index: 6, kind: input, shape index: {}]   ;;  %s1430_s7 = inlined_call_operand.vmem [shape: f32[1,32], index: 7, kind: input, shape index: {}]   ;;  %s1431_s8 = inlined_call_operand.<no memory space> [shape: f32[1,1], index: 8, kind: input, shape index: {}]   ;;  %s1432_s9 = inlined_call_operand.vmem [shape: f32[384,1], index: 9, kind: output, shape index: {}]  }
   0x1   :  { %v14_v0 = vstv %s1431_s8 }
   0x2   :  { %15 = vst [vmem:[#allocation2] sm:$0x1] %v14_v0 }
   0x3 LB: > { %s1038_s12 = sadd.s32 4294967295, %s1125_s11   ;;  %p1042_p0 = scmp.ge.s32.totalorder %s1125_s11, 1  ;;  %s1125_s11 = sphi %s1180_s11, %s21_s11  }
   0x4   : > { %p301_p1 = scmp.lt.s32.totalorder %s1125_s11, 4 }
   0x6   : > { %p302_p2 = pnand %p1042_p0, %p301_p1 }
   0x7   : > { %s1043_s18 = sshll.u32 (!%p302_p2), %s1038_s12, 4 }
   0x8   : > { %305 = sbr.rel (%p302_p2) target bundleno = 529 (0x211), region = 56  ;;  %p343_p3 = scmp.lt.s32.totalorder (!%p302_p2), %s1043_s18, 47 }
   0xd   : > { %v381_v1 = vld [vmem:[%s1425_s2 + $0x8] sm:$0xff]  ;;  %v398_v2 = vld [vmem:[%s1426_s3] sm:$0xf]  ;;  %vm448_vm0 = vcmask 1043456   ;;  %s1434_s18 = smov (!%p343_p3, %s1043_s18), 47  ;;  %vm399_vm1 = vcmask 31744  }
   0xe   : > { %v380_v3 = vld [vmem:[%s1425_s2] sm:$0xff]  ;;  %580 = vmatpush.msra.mxu1 %v381_v1  ;;  %1049 = vmatpush.msk.msra.mxu0 %vm448_vm0, %v398_v2  ;;  %s1197_s19 = sshll.u32 %s1434_s18, 3  ;;  %vm517_vm2 = vcmask 130048   ;;  %v701_v36 = vld [vmem:[%s1428_s5 + $0x18] sm:$0xff]  ;;  %v700_v37 = vld [vmem:[%s1428_s5 + $0x10] sm:$0xff]  ;;  %vm705_vm4 = vcmask 261120  }
   0xf   : > { %1100 = vmatpush.msk.msra.mxu3 %vm448_vm0, %v398_v2  ;;  %s1203_s22 = scalar_lea.vmem %s1424_s1, %s1197_s19  ;;  %s1209_s25 = scalar_lea.vmem %s1423_s0, %s1197_s19  ;;  %766 = vmatpush.msra.mxu2 %v701_v36  ;;  %v699_v38 = vld [vmem:[%s1428_s5 + $0x8] sm:$0xff]  ;;  %v698_v39 = vld [vmem:[%s1428_s5] sm:$0xff] }
  0x10   : > { %581 = vmatpush.msra.mxu1 %v380_v3  ;;  %v382_v4 = vld [vmem:[%s1203_s22] sm:$0xff]  ;;  %v395_v6 = vld [vmem:[%s1203_s22 + $0x68] sm:$0xff]  ;;  %v396_v9 = vld [vmem:[%s1203_s22 + $0x70] sm:$0xff] }
  0x11   : > { %1101 = vmatpush.msrb.mxu3 %v381_v1  ;;  %v364_v5 = vld [vmem:[%s1209_s25] sm:$0xff]  ;;  %1050 = vmatmul.msk.f32.vlgmr.msra.gmra.mxu0 %vm399_vm1, %v382_v4  ;;  %v383_v7 = vld [vmem:[%s1203_s22 + $0x8] sm:$0xff]  ;;  %v384_v10 = vld [vmem:[%s1203_s22 + $0x10] sm:$0xff] }
  0x12   : > { %1066 = vmatmul.msk.f32.vlgmr.msra.gmra.mxu1 %vm517_vm2, %v364_v5  ;;  %1063 = vmatmul.msk.f32.vlgmr.msra.gmra.mxu3 %vm399_vm1, %v395_v6  ;;  %v365_v8 = vld [vmem:[%s1209_s25 + $0x8] sm:$0xff]  ;;  %v366_v11 = vld [vmem:[%s1209_s25 + $0x10] sm:$0xff]  ;;  %v397_v12 = vld [vmem:[%s1203_s22 + $0x78] sm:$0xff] }
  0x13   : > { %1102 = vmatpush.msrb.mxu3 %v380_v3  ;;  %v385_v13 = vld [vmem:[%s1203_s22 + $0x18] sm:$0xff]  ;;  %v376_v15 = vld [vmem:[%s1209_s25 + $0x60] sm:$0xff]  ;;  %v377_v18 = vld [vmem:[%s1209_s25 + $0x68] sm:$0xff]  ;;  %767 = vmatpush.msra.mxu2 %v700_v37 }
  0x14   : > { %v367_v14 = vld [vmem:[%s1209_s25 + $0x18] sm:$0xff]  ;;  %v386_v16 = vld [vmem:[%s1203_s22 + $0x20] sm:$0xff]  ;;  %v387_v19 = vld [vmem:[%s1203_s22 + $0x28] sm:$0xff] }
  0x15   : > { %v368_v17 = vld [vmem:[%s1209_s25 + $0x20] sm:$0xff]  ;;  %v369_v20 = vld [vmem:[%s1209_s25 + $0x28] sm:$0xff]  ;;  %v378_v21 = vld [vmem:[%s1209_s25 + $0x70] sm:$0xff]  ;;  %1103 = vmatpush.msra.mxu3 %v701_v36  ;;  %768 = vmatpush.msra.mxu2 %v699_v38 }
  0x16   : > { %v388_v22 = vld [vmem:[%s1203_s22 + $0x30] sm:$0xff]  ;;  %v379_v24 = vld [vmem:[%s1209_s25 + $0x78] sm:$0xff]  ;;  %v390_v27 = vld [vmem:[%s1203_s22 + $0x40] sm:$0xff] }
  0x17   : > { %v370_v23 = vld [vmem:[%s1209_s25 + $0x30] sm:$0xff]  ;;  %v389_v25 = vld [vmem:[%s1203_s22 + $0x38] sm:$0xff]  ;;  %v372_v28 = vld [vmem:[%s1209_s25 + $0x40] sm:$0xff]  ;;  %1104 = vmatpush.msra.mxu3 %v700_v37  ;;  %769 = vmatpush.msra.mxu2 %v698_v39 }
  0x18   : > { %v371_v26 = vld [vmem:[%s1209_s25 + $0x38] sm:$0xff]  ;;  %v391_v29 = vld [vmem:[%s1203_s22 + $0x48] sm:$0xff]  ;;  %v392_v31 = vld [vmem:[%s1203_s22 + $0x50] sm:$0xff] }
  0x19   : > { %1051 = vmatmul.msk.f32.gmra.mxu0 %vm399_vm1, %v383_v7  ;;  %v373_v30 = vld [vmem:[%s1209_s25 + $0x48] sm:$0xff]  ;;  %v374_v32 = vld [vmem:[%s1209_s25 + $0x50] sm:$0xff]  ;;  %v393_v33 = vld [vmem:[%s1203_s22 + $0x58] sm:$0xff]  ;;  %1105 = vmatpush.msra.mxu3 %v699_v38 }
  0x1a   : > { %1067 = vmatmul.msk.f32.gmra.mxu1 %vm517_vm2, %v365_v8  ;;  %1064 = vmatmul.msk.f32.gmra.mxu3 %vm399_vm1, %v396_v9  ;;  %v375_v34 = vld [vmem:[%s1209_s25 + $0x58] sm:$0xff]  ;;  %v394_v35 = vld [vmem:[%s1203_s22 + $0x60] sm:$0xff]  ;;  %s1384_s22 = scalar_lea.vmem %s1432_s9, %s1197_s19 }
  0x1b   : > { %1106 = vmatpush.msra.mxu3 %v698_v39  ;;  %v1290_v40 = vld [vmem:[%s1427_s4] ss:$0 sm:$0xff] }
  0x21   : > { %1052 = vmatmul.msk.f32.gmra.mxu0 %vm399_vm1, %v384_v10 }
  0x22   : > { %1068 = vmatmul.msk.f32.gmra.mxu1 %vm517_vm2, %v366_v11  ;;  %1065 = vmatmul.msk.f32.gmra.mxu3 %vm399_vm1, %v397_v12 }
  0x29   : > { %1053 = vmatmul.msk.f32.gmra.mxu0 %vm399_vm1, %v385_v13 }
  0x2a   : > { %1069 = vmatmul.msk.f32.gmra.mxu1 %vm517_vm2, %v367_v14  ;;  %1078 = vmatmul.msk.f32.vlgmr.msrb.gmra.mxu3 %vm517_vm2, %v376_v15 }
  0x31   : > { %1054 = vmatmul.msk.f32.gmra.mxu0 %vm399_vm1, %v386_v16 }
  0x32   : > { %1070 = vmatmul.msk.f32.gmra.mxu1 %vm517_vm2, %v368_v17  ;;  %1079 = vmatmul.msk.f32.gmra.mxu3 %vm517_vm2, %v377_v18 }
  0x39   : > { %1055 = vmatmul.msk.f32.gmra.mxu0 %vm399_vm1, %v387_v19 }
  0x3a   : > { %1071 = vmatmul.msk.f32.gmra.mxu1 %vm517_vm2, %v369_v20  ;;  %1080 = vmatmul.msk.f32.gmra.mxu3 %vm517_vm2, %v378_v21 }
  0x41   : > { %1056 = vmatmul.msk.f32.gmra.mxu0 %vm399_vm1, %v388_v22 }
  0x42   : > { %1072 = vmatmul.msk.f32.gmra.mxu1 %vm517_vm2, %v370_v23  ;;  %1081 = vmatmul.msk.f32.gmra.mxu3 %vm517_vm2, %v379_v24 }
  0x49   : > { %1057 = vmatmul.msk.f32.gmra.mxu0 %vm399_vm1, %v389_v25 }
  0x4a   : > { %1073 = vmatmul.msk.f32.gmra.mxu1 %vm517_vm2, %v371_v26 }
  0x51   : > { %1058 = vmatmul.msk.f32.gmra.mxu0 %vm399_vm1, %v390_v27 }
  0x52   : > { %1074 = vmatmul.msk.f32.gmra.mxu1 %vm517_vm2, %v372_v28 }
  0x59   : > { %1059 = vmatmul.msk.f32.gmra.mxu0 %vm399_vm1, %v391_v29 }
  0x5a   : > { %1075 = vmatmul.msk.f32.gmra.mxu1 %vm517_vm2, %v373_v30 }
  0x61   : > { %1060 = vmatmul.msk.f32.gmra.mxu0 %vm399_vm1, %v392_v31 }
  0x62   : > { %1076 = vmatmul.msk.f32.gmra.mxu1 %vm517_vm2, %v374_v32 }
  0x69   : > { %1061 = vmatmul.msk.f32.gmra.mxu0 %vm399_vm1, %v393_v33 }
  0x6a   : > { %1077 = vmatmul.msk.f32.gmra.mxu1 %vm517_vm2, %v375_v34 }
  0x71   : > { %1062 = vmatmul.msk.f32.gmra.mxu0 %vm399_vm1, %v394_v35 }
  0x8e   : > { %v469_v41 = vpop.f32.mrf.mxu0 }
  0x8f   : > { %v583_v42 = vpop.f32.mrf.mxu1 }
  0x90   : > { %v584_v43 = vadd.f32 %v583_v42, %v469_v41 }
  0x92   : > { %v634_v44 = vadd.f32 %v1290_v40, %v584_v43 }
  0x94   : > { %vm650_vm3 = vcmp.gt.f32.partialorder %v634_v44, 0.0  ;;  %v666_v45 = vmul.f32 0.01, %v634_v44 }
  0x95   : > { %v508_v16 = vpop.f32.mrf.mxu3 }
  0x96   : > { %v682_v46 = vsel %vm650_vm3, %v634_v44, %v666_v45  ;;  %v472_v47 = vpop.f32.mrf.mxu0 }
  0x97   : > { %v586_v48 = vpop.f32.mrf.mxu1  ;;  %1082 = vmatmul.msk.f32.vlgmr.msra.gmra.mxu2 %vm705_vm4, %v682_v46 }
  0x98   : > { %v587_v49 = vadd.f32 %v586_v48, %v472_v47 }
  0x9a   : > { %v635_v50 = vadd.f32 %v1290_v40, %v587_v49 }
  0x9c   : > { %vm651_vm5 = vcmp.gt.f32.partialorder %v635_v50, 0.0  ;;  %v667_v51 = vmul.f32 0.01, %v635_v50 }
  0x9d   : > { %v511_v24 = vpop.f32.mrf.mxu3 }
  0x9e   : > { %v683_v52 = vsel %vm651_vm5, %v635_v50, %v667_v51  ;;  %v475_v53 = vpop.f32.mrf.mxu0 }
  0x9f   : > { %v589_v54 = vpop.f32.mrf.mxu1  ;;  %1083 = vmatmul.msk.f32.gmra.mxu2 %vm705_vm4, %v683_v52 }
  0xa0   : > { %v590_v55 = vadd.f32 %v589_v54, %v475_v53 }
  0xa2   : > { %v636_v56 = vadd.f32 %v1290_v40, %v590_v55 }
  0xa4   : > { %vm652_vm6 = vcmp.gt.f32.partialorder %v636_v56, 0.0  ;;  %v668_v57 = vmul.f32 0.01, %v636_v56 }
  0xa5   : > { %v514_v32 = vpop.f32.mrf.mxu3 }
  0xa6   : > { %v684_v58 = vsel %vm652_vm6, %v636_v56, %v668_v57  ;;  %v478_v59 = vpop.f32.mrf.mxu0 }
  0xa7   : > { %v592_v60 = vpop.f32.mrf.mxu1  ;;  %1084 = vmatmul.msk.f32.gmra.mxu2 %vm705_vm4, %v684_v58 }
  0xa8   : > { %v593_v61 = vadd.f32 %v592_v60, %v478_v59 }
  0xaa   : > { %v637_v62 = vadd.f32 %v1290_v40, %v593_v61 }
  0xac   : > { %vm653_vm7 = vcmp.gt.f32.partialorder %v637_v62, 0.0  ;;  %v669_v63 = vmul.f32 0.01, %v637_v62 }
  0xad   : > { %v619_v44 = vpop.f32.mrf.mxu3 }
  0xae   : > { %v685_v0 = vsel %vm653_vm7, %v637_v62, %v669_v63  ;;  %v481_v1 = vpop.f32.mrf.mxu0 }
  0xaf   : > { %v595_v2 = vpop.f32.mrf.mxu1  ;;  %1085 = vmatmul.msk.f32.gmra.mxu2 %vm705_vm4, %v685_v0 }
  0xb0   : > { %v596_v3 = vadd.f32 %v595_v2, %v481_v1 }
  0xb2   : > { %v638_v4 = vadd.f32 %v1290_v40, %v596_v3 }
  0xb4   : > { %vm654_vm8 = vcmp.gt.f32.partialorder %v638_v4, 0.0  ;;  %v670_v5 = vmul.f32 0.01, %v638_v4 }
  0xb5   : > { %v622_v52 = vpop.f32.mrf.mxu3 }
  0xb6   : > { %v686_v6 = vsel %vm654_vm8, %v638_v4, %v670_v5  ;;  %v484_v7 = vpop.f32.mrf.mxu0  ;;  %v623_v57 = vadd.f32 %v622_v52, %v508_v16 }
  0xb7   : > { %v598_v8 = vpop.f32.mrf.mxu1  ;;  %1086 = vmatmul.msk.f32.gmra.mxu2 %vm705_vm4, %v686_v6 }
  0xb8   : > { %v599_v9 = vadd.f32 %v598_v8, %v484_v7  ;;  %v647_v61 = vadd.f32 %v1290_v40, %v623_v57 }
  0xba   : > { %v639_v10 = vadd.f32 %v1290_v40, %v599_v9  ;;  %v679_v0 = vmul.f32 0.01, %v647_v61  ;;  %vm663_vm1 = vcmp.gt.f32.partialorder %v647_v61, 0.0 }
  0xbc   : > { %vm655_vm9 = vcmp.gt.f32.partialorder %v639_v10, 0.0  ;;  %v671_v11 = vmul.f32 0.01, %v639_v10  ;;  %v695_v2 = vsel %vm663_vm1, %v647_v61, %v679_v0 }
  0xbd   : > { %v625_v60 = vpop.f32.mrf.mxu3 }
  0xbe   : > { %v687_v12 = vsel %vm655_vm9, %v639_v10, %v671_v11  ;;  %v487_v13 = vpop.f32.mrf.mxu0  ;;  %v626_v63 = vadd.f32 %v625_v60, %v511_v24  ;;  %v1327_v10 = vld [vmem:[%s1429_s6] ss:$0 sm:$0xff] }
  0xbf   : > { %v601_v14 = vpop.f32.mrf.mxu1  ;;  %1087 = vmatmul.msk.f32.gmra.mxu2 %vm705_vm4, %v687_v12 }
  0xc0   : > { %v602_v15 = vadd.f32 %v601_v14, %v487_v13  ;;  %v648_v1 = vadd.f32 %v1290_v40, %v626_v63 }
  0xc2   : > { %v640_v17 = vadd.f32 %v1290_v40, %v602_v15  ;;  %v680_v5 = vmul.f32 0.01, %v648_v1  ;;  %vm664_vm2 = vcmp.gt.f32.partialorder %v648_v1, 0.0 }
  0xc4   : > { %vm656_vm10 = vcmp.gt.f32.partialorder %v640_v17, 0.0  ;;  %v672_v18 = vmul.f32 0.01, %v640_v17  ;;  %v696_v7 = vsel %vm664_vm2, %v648_v1, %v680_v5 }
  0xc5   : > { %v628_v3 = vpop.f32.mrf.mxu3 }
  0xc6   : > { %v688_v19 = vsel %vm656_vm10, %v640_v17, %v672_v18  ;;  %v490_v20 = vpop.f32.mrf.mxu0  ;;  %v629_v4 = vadd.f32 %v628_v3, %v514_v32 }
  0xc7   : > { %v604_v21 = vpop.f32.mrf.mxu1  ;;  %1088 = vmatmul.msk.f32.gmra.mxu2 %vm705_vm4, %v688_v19 }
  0xc8   : > { %v605_v22 = vadd.f32 %v604_v21, %v490_v20  ;;  %v649_v6 = vadd.f32 %v1290_v40, %v629_v4 }
  0xca   : > { %v641_v23 = vadd.f32 %v1290_v40, %v605_v22  ;;  %v681_v8 = vmul.f32 0.01, %v649_v6  ;;  %vm665_vm3 = vcmp.gt.f32.partialorder %v649_v6, 0.0 }
  0xcc   : > { %vm657_vm11 = vcmp.gt.f32.partialorder %v641_v23, 0.0  ;;  %v673_v25 = vmul.f32 0.01, %v641_v23  ;;  %v697_v9 = vsel %vm665_vm3, %v649_v6, %v681_v8 }
  0xce   : > { %v689_v26 = vsel %vm657_vm11, %v641_v23, %v673_v25  ;;  %v493_v27 = vpop.f32.mrf.mxu0 }
  0xcf   : > { %v607_v28 = vpop.f32.mrf.mxu1  ;;  %1089 = vmatmul.msk.f32.gmra.mxu2 %vm705_vm4, %v689_v26 }
  0xd0   : > { %v608_v29 = vadd.f32 %v607_v28, %v493_v27 }
  0xd2   : > { %v642_v30 = vadd.f32 %v1290_v40, %v608_v29 }
  0xd4   : > { %vm658_vm12 = vcmp.gt.f32.partialorder %v642_v30, 0.0  ;;  %v674_v31 = vmul.f32 0.01, %v642_v30 }
  0xd6   : > { %v690_v33 = vsel %vm658_vm12, %v642_v30, %v674_v31  ;;  %v496_v34 = vpop.f32.mrf.mxu0 }
  0xd7   : > { %v610_v35 = vpop.f32.mrf.mxu1  ;;  %1090 = vmatmul.msk.f32.gmra.mxu2 %vm705_vm4, %v690_v33 }
  0xd8   : > { %v611_v36 = vadd.f32 %v610_v35, %v496_v34 }
  0xda   : > { %v643_v37 = vadd.f32 %v1290_v40, %v611_v36 }
  0xdc   : > { %vm659_vm13 = vcmp.gt.f32.partialorder %v643_v37, 0.0  ;;  %v675_v38 = vmul.f32 0.01, %v643_v37 }
  0xde   : > { %v691_v39 = vsel %vm659_vm13, %v643_v37, %v675_v38  ;;  %v499_v41 = vpop.f32.mrf.mxu0 }
  0xdf   : > { %v613_v42 = vpop.f32.mrf.mxu1  ;;  %1091 = vmatmul.msk.f32.gmra.mxu2 %vm705_vm4, %v691_v39 }
  0xe0   : > { %v614_v43 = vadd.f32 %v613_v42, %v499_v41 }
  0xe2   : > { %v644_v45 = vadd.f32 %v1290_v40, %v614_v43 }
  0xe4   : > { %vm660_vm14 = vcmp.gt.f32.partialorder %v644_v45, 0.0  ;;  %v676_v46 = vmul.f32 0.01, %v644_v45 }
  0xe6   : > { %v692_v47 = vsel %vm660_vm14, %v644_v45, %v676_v46  ;;  %v502_v48 = vpop.f32.mrf.mxu0 }
  0xe7   : > { %v616_v49 = vpop.f32.mrf.mxu1  ;;  %1092 = vmatmul.msk.f32.gmra.mxu2 %vm705_vm4, %v692_v47 }
  0xe8   : > { %v617_v50 = vadd.f32 %v616_v49, %v502_v48 }
  0xea   : > { %v645_v51 = vadd.f32 %v1290_v40, %v617_v50 }
  0xec   : > { %vm661_vm15 = vcmp.gt.f32.partialorder %v645_v51, 0.0  ;;  %v677_v53 = vmul.f32 0.01, %v645_v51 }
  0xee   : > { %v693_v54 = vsel %vm661_vm15, %v645_v51, %v677_v53  ;;  %v505_v55 = vpop.f32.mrf.mxu0 }
  0xef   : > { %1093 = vmatmul.msk.f32.gmra.mxu2 %vm705_vm4, %v693_v54  ;;  %v620_v56 = vadd.f32 %v619_v44, %v505_v55 }
  0xf1   : > { %v646_v58 = vadd.f32 %v1290_v40, %v620_v56  ;;  %v1333_v40 = vld [vmem:[%s1430_s7] ss:$0 sm:$0xff] }
  0xf3   : > { %vm662_vm0 = vcmp.gt.f32.partialorder %v646_v58, 0.0  ;;  %v678_v59 = vmul.f32 0.01, %v646_v58 }
  0xf5   : > { %v694_v62 = vsel %vm662_vm0, %v646_v58, %v678_v59 }
  0xf6   : > { %1094 = vmatmul.msk.f32.vlgmr.msra.gmra.mxu3 %vm705_vm4, %v694_v62 }
  0xfe   : > { %1095 = vmatmul.msk.f32.gmra.mxu3 %vm705_vm4, %v695_v2 }
 0x106   : > { %1096 = vmatmul.msk.f32.gmra.mxu3 %vm705_vm4, %v696_v7 }
 0x10e   : > { %1097 = vmatmul.msk.f32.gmra.mxu3 %vm705_vm4, %v697_v9 }
 0x11a   : > { %v771_v11 = vpop.f32.mrf.mxu2 }
 0x11b   : > { %v772_v12 = vadd.f32 %v1327_v10, %v771_v11 }
 0x11d   : > { %v835_v13 = vmul.f32 0.01, %v772_v12  ;;  %vm819_vm5 = vcmp.gt.f32.partialorder %v772_v12, 0.0 }
 0x11f   : > { %v851_v14 = vsel %vm819_vm5, %v772_v12, %v835_v13 }
 0x120   : > { %v870_v15 = vmul.f32 %v1333_v40, %v851_v14 }
 0x122   : > { %v774_v16 = vpop.f32.mrf.mxu2  ;;  %v886_v17 = vsel %vm705_vm4, %v870_v15, 0.0 }
 0x123   : > { %v775_v18 = vadd.f32 %v1327_v10, %v774_v16  ;;  %887 = vadd.xlane.f32.xlu0 %v886_v17 }
 0x125   : > { %vm820_vm6 = vcmp.gt.f32.partialorder %v775_v18, 0.0  ;;  %v836_v19 = vmul.f32 0.01, %v775_v18 }
 0x127   : > { %v852_v20 = vsel %vm820_vm6, %v775_v18, %v836_v19  ;;  %vm953_vm6 = vcmask 7168  }
 0x128   : > { %v871_v21 = vmul.f32 %v1333_v40, %v852_v20 }
 0x12a   : > { %v777_v22 = vpop.f32.mrf.mxu2  ;;  %v889_v23 = vsel %vm705_vm4, %v871_v21, 0.0 }
 0x12b   : > { %v778_v24 = vadd.f32 %v1327_v10, %v777_v22  ;;  %890 = vadd.xlane.f32.xlu0 %v889_v23 }
 0x12d   : > { %v837_v25 = vmul.f32 0.01, %v778_v24  ;;  %vm821_vm7 = vcmp.gt.f32.partialorder %v778_v24, 0.0 }
 0x12f   : > { %v853_v26 = vsel %vm821_vm7, %v778_v24, %v837_v25 }
 0x130   : > { %v872_v27 = vmul.f32 %v1333_v40, %v853_v26 }
 0x132   : > { %v780_v28 = vpop.f32.mrf.mxu2  ;;  %v892_v29 = vsel %vm705_vm4, %v872_v27, 0.0 }
 0x133   : > { %v781_v30 = vadd.f32 %v1327_v10, %v780_v28  ;;  %893 = vadd.xlane.f32.xlu1 %v892_v29 }
 0x135   : > { %vm822_vm8 = vcmp.gt.f32.partialorder %v781_v30, 0.0  ;;  %v838_v31 = vmul.f32 0.01, %v781_v30 }
 0x137   : > { %v854_v32 = vsel %vm822_vm8, %v781_v30, %v838_v31 }
 0x138   : > { %v873_v33 = vmul.f32 %v1333_v40, %v854_v32 }
 0x13a   : > { %v783_v34 = vpop.f32.mrf.mxu2  ;;  %v895_v35 = vsel %vm705_vm4, %v873_v33, 0.0 }
 0x13b   : > { %v784_v36 = vadd.f32 %v1327_v10, %v783_v34  ;;  %896 = vadd.xlane.f32.xlu1 %v895_v35 }
 0x13d   : > { %v839_v37 = vmul.f32 0.01, %v784_v36  ;;  %vm823_vm9 = vcmp.gt.f32.partialorder %v784_v36, 0.0 }
 0x13f   : > { %v855_v38 = vsel %vm823_vm9, %v784_v36, %v839_v37 }
 0x140   : > { %v874_v39 = vmul.f32 %v1333_v40, %v855_v38 }
 0x142   : > { %v786_v41 = vpop.f32.mrf.mxu2  ;;  %v898_v42 = vsel %vm705_vm4, %v874_v39, 0.0 }
 0x143   : > { %v787_v43 = vadd.f32 %v1327_v10, %v786_v41  ;;  %899 = vadd.xlane.f32.xlu2 %v898_v42  ;;  %v1118_v42 = vld [vmem:[#allocation2] ss:$0 sm:$0xff] }
 0x145   : > { %vm824_vm10 = vcmp.gt.f32.partialorder %v787_v43, 0.0  ;;  %v840_v44 = vmul.f32 0.01, %v787_v43 }
 0x147   : > { %v856_v45 = vsel %vm824_vm10, %v787_v43, %v840_v44 }
 0x148   : > { %v875_v46 = vmul.f32 %v1333_v40, %v856_v45 }
 0x14a   : > { %v789_v47 = vpop.f32.mrf.mxu2  ;;  %v901_v48 = vsel %vm705_vm4, %v875_v46, 0.0 }
 0x14b   : > { %v790_v49 = vadd.f32 %v1327_v10, %v789_v47  ;;  %902 = vadd.xlane.f32.xlu2 %v901_v48 }
 0x14d   : > { %vm825_vm11 = vcmp.gt.f32.partialorder %v790_v49, 0.0  ;;  %v841_v50 = vmul.f32 0.01, %v790_v49 }
 0x14f   : > { %v857_v51 = vsel %vm825_vm11, %v790_v49, %v841_v50 }
 0x150   : > { %v876_v52 = vmul.f32 %v1333_v40, %v857_v51 }
 0x152   : > { %v792_v53 = vpop.f32.mrf.mxu2  ;;  %v904_v54 = vsel %vm705_vm4, %v876_v52, 0.0 }
 0x153   : > { %v793_v55 = vadd.f32 %v1327_v10, %v792_v53  ;;  %905 = vadd.xlane.f32.xlu0 %v904_v54 }
 0x155   : > { %vm826_vm12 = vcmp.gt.f32.partialorder %v793_v55, 0.0  ;;  %v842_v56 = vmul.f32 0.01, %v793_v55 }
 0x157   : > { %v858_v57 = vsel %vm826_vm12, %v793_v55, %v842_v56 }
 0x158   : > { %v877_v58 = vmul.f32 %v1333_v40, %v858_v57 }
 0x15a   : > { %v795_v59 = vpop.f32.mrf.mxu2  ;;  %v907_v60 = vsel %vm705_vm4, %v877_v58, 0.0 }
 0x15b   : > { %v796_v61 = vadd.f32 %v1327_v10, %v795_v59  ;;  %908 = vadd.xlane.f32.xlu1 %v907_v60 }
 0x15d   : > { %vm827_vm13 = vcmp.gt.f32.partialorder %v796_v61, 0.0  ;;  %v843_v62 = vmul.f32 0.01, %v796_v61 }
 0x15f   : > { %v859_v63 = vsel %vm827_vm13, %v796_v61, %v843_v62 }
 0x160   : > { %v878_v0 = vmul.f32 %v1333_v40, %v859_v63 }
 0x162   : > { %v798_v1 = vpop.f32.mrf.mxu2  ;;  %v910_v2 = vsel %vm705_vm4, %v878_v0, 0.0 }
 0x163   : > { %v799_v3 = vadd.f32 %v1327_v10, %v798_v1  ;;  %911 = vadd.xlane.f32.xlu2 %v910_v2 }
 0x165   : > { %vm828_vm14 = vcmp.gt.f32.partialorder %v799_v3, 0.0  ;;  %v844_v4 = vmul.f32 0.01, %v799_v3 }
 0x167   : > { %v860_v5 = vsel %vm828_vm14, %v799_v3, %v844_v4 }
 0x168   : > { %v879_v6 = vmul.f32 %v1333_v40, %v860_v5 }
 0x16a   : > { %v801_v7 = vpop.f32.mrf.mxu2  ;;  %v913_v8 = vsel %vm705_vm4, %v879_v6, 0.0 }
 0x16b   : > { %v802_v9 = vadd.f32 %v1327_v10, %v801_v7  ;;  %914 = vadd.xlane.f32.xlu0 %v913_v8 }
 0x16d   : > { %vm829_vm15 = vcmp.gt.f32.partialorder %v802_v9, 0.0  ;;  %v845_v11 = vmul.f32 0.01, %v802_v9 }
 0x16f   : > { %v861_v12 = vsel %vm829_vm15, %v802_v9, %v845_v11 }
 0x170   : > { %v880_v13 = vmul.f32 %v1333_v40, %v861_v12 }
 0x172   : > { %v804_v14 = vpop.f32.mrf.mxu2  ;;  %v916_v15 = vsel %vm705_vm4, %v880_v13, 0.0 }
 0x173   : > { %v805_v16 = vadd.f32 %v1327_v10, %v804_v14  ;;  %917 = vadd.xlane.f32.xlu1 %v916_v15 }
 0x175   : > { %vm830_vm0 = vcmp.gt.f32.partialorder %v805_v16, 0.0  ;;  %v846_v17 = vmul.f32 0.01, %v805_v16 }
 0x177   : > { %v862_v18 = vsel %vm830_vm0, %v805_v16, %v846_v17 }
 0x178   : > { %v881_v19 = vmul.f32 %v1333_v40, %v862_v18 }
 0x179   : > { %v807_v20 = vpop.f32.mrf.mxu3 }
 0x17a   : > { %v919_v21 = vsel %vm705_vm4, %v881_v19, 0.0  ;;  %v808_v22 = vadd.f32 %v1327_v10, %v807_v20 }
 0x17b   : > { %920 = vadd.xlane.f32.xlu2 %v919_v21 }
 0x17c   : > { %vm831_vm1 = vcmp.gt.f32.partialorder %v808_v22, 0.0  ;;  %v847_v23 = vmul.f32 0.01, %v808_v22 }
 0x17e   : > { %v863_v24 = vsel %vm831_vm1, %v808_v22, %v847_v23 }
 0x17f   : > { %v882_v25 = vmul.f32 %v1333_v40, %v863_v24 }
 0x181   : > { %v810_v26 = vpop.f32.mrf.mxu3  ;;  %v922_v27 = vsel %vm705_vm4, %v882_v25, 0.0 }
 0x182   : > { %v811_v28 = vadd.f32 %v1327_v10, %v810_v26  ;;  %923 = vadd.xlane.f32.xlu0 %v922_v27 }
 0x184   : > { %vm832_vm2 = vcmp.gt.f32.partialorder %v811_v28, 0.0  ;;  %v848_v29 = vmul.f32 0.01, %v811_v28 }
 0x186   : > { %v864_v30 = vsel %vm832_vm2, %v811_v28, %v848_v29 }
 0x187   : > { %v883_v31 = vmul.f32 %v1333_v40, %v864_v30 }
 0x189   : > { %v813_v32 = vpop.f32.mrf.mxu3  ;;  %v925_v33 = vsel %vm705_vm4, %v883_v31, 0.0 }
 0x18a   : > { %v814_v34 = vadd.f32 %v1327_v10, %v813_v32  ;;  %926 = vadd.xlane.f32.xlu1 %v925_v33 }
 0x18c   : > { %vm833_vm3 = vcmp.gt.f32.partialorder %v814_v34, 0.0  ;;  %v849_v35 = vmul.f32 0.01, %v814_v34 }
 0x18e   : > { %v865_v36 = vsel %vm833_vm3, %v814_v34, %v849_v35 }
 0x18f   : > { %v884_v37 = vmul.f32 %v1333_v40, %v865_v36 }
 0x191   : > { %v816_v38 = vpop.f32.mrf.mxu3  ;;  %v928_v39 = vsel %vm705_vm4, %v884_v37, 0.0 }
 0x192   : > { %v817_v41 = vadd.f32 %v1327_v10, %v816_v38  ;;  %929 = vadd.xlane.f32.xlu2 %v928_v39 }
 0x194   : > { %vm834_vm5 = vcmp.gt.f32.partialorder %v817_v41, 0.0  ;;  %v850_v43 = vmul.f32 0.01, %v817_v41 }
 0x196   : > { %v888_v44 = vpop.xlane.xlu0 %887  ;;  %v866_v46 = vsel %vm834_vm5, %v817_v41, %v850_v43 }
 0x197   : > { %v937_v45 = vadd.f32 %v1118_v42, %v888_v44  ;;  %v885_v10 = vmul.f32 %v1333_v40, %v866_v46 }
 0x199   : > { %954 = vst.msk [vmem:[%s1384_s22] sm:$0xff] %vm953_vm6, %v937_v45  ;;  %v931_v47 = vsel %vm705_vm4, %v885_v10, 0.0 }
 0x19a   : > { %932 = vadd.xlane.f32.xlu0 %v931_v47 }
 0x19e   : > { %v891_v48 = vpop.xlane.xlu0 %890 }
 0x19f   : > { %v938_v49 = vadd.f32 %v1118_v42, %v891_v48 }
 0x1a1   : > { %955 = vst.msk [vmem:[%s1384_s22 + $0x8] sm:$0xff] %vm953_vm6, %v938_v49 }
 0x1a6   : > { %v894_v50 = vpop.xlane.xlu1 %893 }
 0x1a7   : > { %v939_v51 = vadd.f32 %v1118_v42, %v894_v50 }
 0x1a9   : > { %956 = vst.msk [vmem:[%s1384_s22 + $0x10] sm:$0xff] %vm953_vm6, %v939_v51 }
 0x1ae   : > { %v897_v52 = vpop.xlane.xlu1 %896 }
 0x1af   : > { %v940_v53 = vadd.f32 %v1118_v42, %v897_v52 }
 0x1b1   : > { %957 = vst.msk [vmem:[%s1384_s22 + $0x18] sm:$0xff] %vm953_vm6, %v940_v53 }
 0x1b6   : > { %v900_v40 = vpop.xlane.xlu2 %899 }
 0x1b7   : > { %v941_v54 = vadd.f32 %v1118_v42, %v900_v40 }
 0x1b9   : > { %958 = vst.msk [vmem:[%s1384_s22 + $0x20] sm:$0xff] %vm953_vm6, %v941_v54 }
 0x1be   : > { %v903_v55 = vpop.xlane.xlu2 %902 }
 0x1bf   : > { %v942_v56 = vadd.f32 %v1118_v42, %v903_v55 }
 0x1c1   : > { %959 = vst.msk [vmem:[%s1384_s22 + $0x28] sm:$0xff] %vm953_vm6, %v942_v56 }
 0x1c6   : > { %v906_v57 = vpop.xlane.xlu0 %905 }
 0x1c7   : > { %v943_v58 = vadd.f32 %v1118_v42, %v906_v57 }
 0x1c9   : > { %960 = vst.msk [vmem:[%s1384_s22 + $0x30] sm:$0xff] %vm953_vm6, %v943_v58 }
 0x1ce   : > { %v909_v59 = vpop.xlane.xlu1 %908 }
 0x1cf   : > { %v944_v60 = vadd.f32 %v1118_v42, %v909_v59 }
 0x1d1   : > { %961 = vst.msk [vmem:[%s1384_s22 + $0x38] sm:$0xff] %vm953_vm6, %v944_v60 }
 0x1d6   : > { %v912_v61 = vpop.xlane.xlu2 %911 }
 0x1d7   : > { %v945_v62 = vadd.f32 %v1118_v42, %v912_v61 }
 0x1d9   : > { %962 = vst.msk [vmem:[%s1384_s22 + $0x40] sm:$0xff] %vm953_vm6, %v945_v62 }
 0x1de   : > { %v915_v63 = vpop.xlane.xlu0 %914 }
 0x1df   : > { %v946_v0 = vadd.f32 %v1118_v42, %v915_v63 }
 0x1e1   : > { %963 = vst.msk [vmem:[%s1384_s22 + $0x48] sm:$0xff] %vm953_vm6, %v946_v0 }
 0x1e6   : > { %v918_v1 = vpop.xlane.xlu1 %917 }
 0x1e7   : > { %v947_v2 = vadd.f32 %v1118_v42, %v918_v1 }
 0x1e9   : > { %964 = vst.msk [vmem:[%s1384_s22 + $0x50] sm:$0xff] %vm953_vm6, %v947_v2 }
 0x1ee   : > { %v921_v3 = vpop.xlane.xlu2 %920 }
 0x1ef   : > { %v948_v4 = vadd.f32 %v1118_v42, %v921_v3 }
 0x1f1   : > { %965 = vst.msk [vmem:[%s1384_s22 + $0x58] sm:$0xff] %vm953_vm6, %v948_v4 }
 0x1f5   : > { %v924_v5 = vpop.xlane.xlu0 %923 }
 0x1f6   : > { %v949_v6 = vadd.f32 %v1118_v42, %v924_v5 }
 0x1f8   : > { %966 = vst.msk [vmem:[%s1384_s22 + $0x60] sm:$0xff] %vm953_vm6, %v949_v6 }
 0x1fd   : > { %v927_v7 = vpop.xlane.xlu1 %926 }
 0x1fe   : > { %v950_v8 = vadd.f32 %v1118_v42, %v927_v7 }
 0x200   : > { %967 = vst.msk [vmem:[%s1384_s22 + $0x68] sm:$0xff] %vm953_vm6, %v950_v8 }
 0x205   : > { %v930_v9 = vpop.xlane.xlu2 %929 }
 0x206   : > { %v951_v11 = vadd.f32 %v1118_v42, %v930_v9 }
 0x208   : > { %968 = vst.msk [vmem:[%s1384_s22 + $0x70] sm:$0xff] %vm953_vm6, %v951_v11 }
 0x20d   : > { %v933_v12 = vpop.xlane.xlu0 %932 }
 0x20e   : > { %v952_v13 = vadd.f32 %v1118_v42, %v933_v12 }
 0x210   : > { %969 = vst.msk [vmem:[%s1384_s22 + $0x78] sm:$0xff] %vm953_vm6, %v952_v13 }
 0x211 PF: > { %s21_s11 = sadd.s32 1, %s1125_s11  }
 0x212   : > { %p18_p4 = scmp.ge.s32.totalorder %s21_s11, 5  }
 0x214   :  { %20 = sbr.rel (!%p18_p4) target bundleno = 3 (0x3), region = 89 }

</bundles_post_ra>
